<compile_context>
chip_gen: v5e
topology: v5e:2x2
jax: 0.10.0
libtpu: 0.0.40
codegen_flags: <defaults>
</compile_context>

<pallas_src>
import functools

import jax
import jax.numpy as jnp
from jax import lax
from jax.experimental import pallas as pl
from jax.experimental.pallas import tpu as pltpu

INPUT_SIZE = 10
HIDDEN_SIZE = 20
OUTPUT_SIZE = 1


def _rnn_kernel(x_ref, wih_ref, whh_ref, b_ref, wfc_ref, bfc_ref, out_ref,
                *, seq_len, batch):
    """Whole (tiny) problem resident in VMEM; recurrence fully unrolled.

    x_ref   : (T*B, I)  time-major, flattened so the hoisted projection is one matmul
    wih_ref : (I, H)    W_ih^T
    whh_ref : (H, H)    W_hh^T
    b_ref   : (1, H)    b_ih + b_hh (pre-summed)
    wfc_ref : (H, O)    W_fc^T
    bfc_ref : (1, O)
    out_ref : (B, O)
    """
    # Hoisted input projection for ALL timesteps in a single MXU pass,
    # with the (pre-summed) recurrent bias folded in once.
    xproj = (jnp.dot(x_ref[...], wih_ref[...], preferred_element_type=jnp.float32)
             + b_ref[...])                                     # (T*B, H)

    whh = whh_ref[...]                                         # (H, H), loaded once
    hidden = whh.shape[0]

    # h_0 = 0; h stays in vregs across the (statically unrolled) recurrence.
    h = jnp.zeros((batch, hidden), jnp.float32)
    for t in range(seq_len):
        xp_t = xproj[t * batch:(t + 1) * batch, :]             # static slice, (B, H)
        h = jnp.tanh(xp_t + jnp.dot(h, whh, preferred_element_type=jnp.float32))

    # fc head on the last hidden state only.
    # (O=1 makes this a masked partial store; micro at this size.)
    out_ref[...] = (jnp.dot(h, wfc_ref[...], preferred_element_type=jnp.float32)
                    + bfc_ref[...])


def simple_rnn_forward(x, params):
    """x: (B, T, I) float32 (batch_first, like the PyTorch module)."""
    w_ih, w_hh, b_ih, b_hh, w_fc, b_fc = params
    B, T, I = x.shape
    H = w_ih.shape[0]
    O = w_fc.shape[0]

    # XLA-side glue only (layout, transposes, bias pre-sum):
    #   time-major then flatten so timestep t occupies rows [t*B, (t+1)*B).
    x_flat = jnp.transpose(x, (1, 0, 2)).reshape(T * B, I).astype(jnp.float32)
    wih_t = w_ih.T                                   # (I, H)
    whh_t = w_hh.T                                   # (H, H)
    wfc_t = w_fc.T                                   # (H, O)
    b2 = (b_ih + b_hh).reshape(1, H)                 # pre-summed recurrent bias
    bfc2 = b_fc.reshape(1, O)

    vmem = pl.BlockSpec(memory_space=pltpu.MemorySpace.VMEM)
    kernel = functools.partial(_rnn_kernel, seq_len=T, batch=B)

    out = pl.pallas_call(
        kernel,
        out_shape=jax.ShapeDtypeStruct((B, O), jnp.float32),
        in_specs=[vmem] * 6,
        out_specs=vmem,
    )(x_flat, wih_t, whh_t, b2, wfc_t, bfc2)
    return out


def init_params(key, input_size, hidden_size, output_size):
    """Deterministic init, PyTorch-style U(-1/sqrt(H), 1/sqrt(H))."""
    ks = jax.random.split(key, 6)
    k_rnn = 1.0 / jnp.sqrt(hidden_size)
    k_fc = 1.0 / jnp.sqrt(hidden_size)
    w_ih = jax.random.uniform(ks[0], (hidden_size, input_size), jnp.float32, -k_rnn, k_rnn)
    w_hh = jax.random.uniform(ks[1], (hidden_size, hidden_size), jnp.float32, -k_rnn, k_rnn)
    b_ih = jax.random.uniform(ks[2], (hidden_size,), jnp.float32, -k_rnn, k_rnn)
    b_hh = jax.random.uniform(ks[3], (hidden_size,), jnp.float32, -k_rnn, k_rnn)
    w_fc = jax.random.uniform(ks[4], (output_size, hidden_size), jnp.float32, -k_fc, k_fc)
    b_fc = jax.random.uniform(ks[5], (output_size,), jnp.float32, -k_fc, k_fc)
    return (w_ih, w_hh, b_ih, b_hh, w_fc, b_fc)


def _reference_forward(x, params):
    """Pure-JAX reference of the same math (sanity check)."""
    w_ih, w_hh, b_ih, b_hh, w_fc, b_fc = params
    B, T, I = x.shape
    h = jnp.zeros((B, w_ih.shape[0]), jnp.float32)

    def step(h, x_t):
        h_new = jnp.tanh(x_t @ w_ih.T + b_ih + h @ w_hh.T + b_hh)
        return h_new, None

    h_last, _ = lax.scan(step, h, jnp.transpose(x, (1, 0, 2)))
    return h_last @ w_fc.T + b_fc


if __name__ == "__main__":
    key = jax.random.PRNGKey(0)
    k_x, k_p = jax.random.split(key)

    batch, seq = 2, 8
    x = jax.random.normal(k_x, (batch, seq, INPUT_SIZE), jnp.float32)
    params = init_params(k_p, INPUT_SIZE, HIDDEN_SIZE, OUTPUT_SIZE)

    out = simple_rnn_forward(x, params)
    out = jax.block_until_ready(out)

    ref = _reference_forward(x, params)
    assert out.shape == (batch, OUTPUT_SIZE), out.shape
    assert jnp.allclose(out, ref, atol=1e-5, rtol=1e-5), (out, ref)

    print("KERNEL_OK")
</pallas_src>

<mosaic_0001>
module attributes {stable_mosaic.version = 11 : i64} {
  func.func @_rnn_kernel(%arg0: memref<16x10xf32, #tpu.memory_space<vmem>>, %arg1: memref<10x20xf32, #tpu.memory_space<vmem>>, %arg2: memref<20x20xf32, #tpu.memory_space<vmem>>, %arg3: memref<1x20xf32, #tpu.memory_space<vmem>>, %arg4: memref<20x1xf32, #tpu.memory_space<vmem>>, %arg5: memref<1x1xf32, #tpu.memory_space<vmem>>, %arg6: memref<2x1xf32, #tpu.memory_space<vmem>>) attributes {dimension_semantics = [], scalar_prefetch = 0 : i64, scratch_operands = 0 : i64, tpu.core_type = #tpu.core_type<tc>} {
    %c0 = arith.constant 0 : index
    %c0_0 = arith.constant 0 : index
    %0 = vector.load %arg0[%c0, %c0_0] : memref<16x10xf32, #tpu.memory_space<vmem>>, vector<16x10xf32>
    %c0_1 = arith.constant 0 : index
    %c0_2 = arith.constant 0 : index
    %1 = vector.load %arg1[%c0_1, %c0_2] : memref<10x20xf32, #tpu.memory_space<vmem>>, vector<10x20xf32>
    %cst = arith.constant dense<0.000000e+00> : vector<16x20xf32>
    %2 = tpu.matmul %0, %1, %cst {dimension_numbers = #tpu.dot_dimension_numbers<[1], [0], [0], [1], [0, 0, 1, 1], [], []>} : vector<16x10xf32>, vector<10x20xf32>, vector<16x20xf32> -> vector<16x20xf32>
    %c0_3 = arith.constant 0 : index
    %c0_4 = arith.constant 0 : index
    %3 = vector.load %arg3[%c0_3, %c0_4] : memref<1x20xf32, #tpu.memory_space<vmem>>, vector<1x20xf32>
    %4 = vector.broadcast %3 : vector<1x20xf32> to vector<16x20xf32>
    %5 = arith.addf %2, %4 : vector<16x20xf32>
    %c0_5 = arith.constant 0 : index
    %c0_6 = arith.constant 0 : index
    %6 = vector.load %arg2[%c0_5, %c0_6] : memref<20x20xf32, #tpu.memory_space<vmem>>, vector<20x20xf32>
    %cst_7 = arith.constant 0.000000e+00 : f32
    %7 = vector.broadcast %cst_7 : f32 to vector<2x20xf32>
    %8 = vector.extract_strided_slice %5 {offsets = [0, 0], sizes = [2, 20], strides = [1, 1]} : vector<16x20xf32> to vector<2x20xf32>
    %cst_8 = arith.constant dense<0.000000e+00> : vector<2x20xf32>
    %9 = tpu.matmul %7, %6, %cst_8 {dimension_numbers = #tpu.dot_dimension_numbers<[1], [0], [0], [1], [0, 0, 1, 1], [], []>} : vector<2x20xf32>, vector<20x20xf32>, vector<2x20xf32> -> vector<2x20xf32>
    %10 = arith.addf %8, %9 : vector<2x20xf32>
    %11 = math.tanh %10 : vector<2x20xf32>
    %12 = vector.extract_strided_slice %5 {offsets = [2, 0], sizes = [2, 20], strides = [1, 1]} : vector<16x20xf32> to vector<2x20xf32>
    %cst_9 = arith.constant dense<0.000000e+00> : vector<2x20xf32>
    %13 = tpu.matmul %11, %6, %cst_9 {dimension_numbers = #tpu.dot_dimension_numbers<[1], [0], [0], [1], [0, 0, 1, 1], [], []>} : vector<2x20xf32>, vector<20x20xf32>, vector<2x20xf32> -> vector<2x20xf32>
    %14 = arith.addf %12, %13 : vector<2x20xf32>
    %15 = math.tanh %14 : vector<2x20xf32>
    %16 = vector.extract_strided_slice %5 {offsets = [4, 0], sizes = [2, 20], strides = [1, 1]} : vector<16x20xf32> to vector<2x20xf32>
    %cst_10 = arith.constant dense<0.000000e+00> : vector<2x20xf32>
    %17 = tpu.matmul %15, %6, %cst_10 {dimension_numbers = #tpu.dot_dimension_numbers<[1], [0], [0], [1], [0, 0, 1, 1], [], []>} : vector<2x20xf32>, vector<20x20xf32>, vector<2x20xf32> -> vector<2x20xf32>
    %18 = arith.addf %16, %17 : vector<2x20xf32>
    %19 = math.tanh %18 : vector<2x20xf32>
    %20 = vector.extract_strided_slice %5 {offsets = [6, 0], sizes = [2, 20], strides = [1, 1]} : vector<16x20xf32> to vector<2x20xf32>
    %cst_11 = arith.constant dense<0.000000e+00> : vector<2x20xf32>
    %21 = tpu.matmul %19, %6, %cst_11 {dimension_numbers = #tpu.dot_dimension_numbers<[1], [0], [0], [1], [0, 0, 1, 1], [], []>} : vector<2x20xf32>, vector<20x20xf32>, vector<2x20xf32> -> vector<2x20xf32>
    %22 = arith.addf %20, %21 : vector<2x20xf32>
    %23 = math.tanh %22 : vector<2x20xf32>
    %24 = vector.extract_strided_slice %5 {offsets = [8, 0], sizes = [2, 20], strides = [1, 1]} : vector<16x20xf32> to vector<2x20xf32>
    %cst_12 = arith.constant dense<0.000000e+00> : vector<2x20xf32>
    %25 = tpu.matmul %23, %6, %cst_12 {dimension_numbers = #tpu.dot_dimension_numbers<[1], [0], [0], [1], [0, 0, 1, 1], [], []>} : vector<2x20xf32>, vector<20x20xf32>, vector<2x20xf32> -> vector<2x20xf32>
    %26 = arith.addf %24, %25 : vector<2x20xf32>
    %27 = math.tanh %26 : vector<2x20xf32>
    %28 = vector.extract_strided_slice %5 {offsets = [10, 0], sizes = [2, 20], strides = [1, 1]} : vector<16x20xf32> to vector<2x20xf32>
    %cst_13 = arith.constant dense<0.000000e+00> : vector<2x20xf32>
    %29 = tpu.matmul %27, %6, %cst_13 {dimension_numbers = #tpu.dot_dimension_numbers<[1], [0], [0], [1], [0, 0, 1, 1], [], []>} : vector<2x20xf32>, vector<20x20xf32>, vector<2x20xf32> -> vector<2x20xf32>
    %30 = arith.addf %28, %29 : vector<2x20xf32>
    %31 = math.tanh %30 : vector<2x20xf32>
    %32 = vector.extract_strided_slice %5 {offsets = [12, 0], sizes = [2, 20], strides = [1, 1]} : vector<16x20xf32> to vector<2x20xf32>
    %cst_14 = arith.constant dense<0.000000e+00> : vector<2x20xf32>
    %33 = tpu.matmul %31, %6, %cst_14 {dimension_numbers = #tpu.dot_dimension_numbers<[1], [0], [0], [1], [0, 0, 1, 1], [], []>} : vector<2x20xf32>, vector<20x20xf32>, vector<2x20xf32> -> vector<2x20xf32>
    %34 = arith.addf %32, %33 : vector<2x20xf32>
    %35 = math.tanh %34 : vector<2x20xf32>
    %36 = vector.extract_strided_slice %5 {offsets = [14, 0], sizes = [2, 20], strides = [1, 1]} : vector<16x20xf32> to vector<2x20xf32>
    %cst_15 = arith.constant dense<0.000000e+00> : vector<2x20xf32>
    %37 = tpu.matmul %35, %6, %cst_15 {dimension_numbers = #tpu.dot_dimension_numbers<[1], [0], [0], [1], [0, 0, 1, 1], [], []>} : vector<2x20xf32>, vector<20x20xf32>, vector<2x20xf32> -> vector<2x20xf32>
    %38 = arith.addf %36, %37 : vector<2x20xf32>
    %39 = math.tanh %38 : vector<2x20xf32>
    %c0_16 = arith.constant 0 : index
    %c0_17 = arith.constant 0 : index
    %40 = vector.load %arg4[%c0_16, %c0_17] : memref<20x1xf32, #tpu.memory_space<vmem>>, vector<20x1xf32>
    %cst_18 = arith.constant dense<0.000000e+00> : vector<2x1xf32>
    %41 = tpu.matmul %39, %40, %cst_18 {dimension_numbers = #tpu.dot_dimension_numbers<[1], [0], [0], [1], [0, 0, 1, 1], [], []>} : vector<2x20xf32>, vector<20x1xf32>, vector<2x1xf32> -> vector<2x1xf32>
    %c0_19 = arith.constant 0 : index
    %c0_20 = arith.constant 0 : index
    %42 = vector.load %arg5[%c0_19, %c0_20] : memref<1x1xf32, #tpu.memory_space<vmem>>, vector<1x1xf32>
    %43 = vector.broadcast %42 : vector<1x1xf32> to vector<2x1xf32>
    %44 = arith.addf %41, %43 : vector<2x1xf32>
    %c0_21 = arith.constant 0 : index
    %c0_22 = arith.constant 0 : index
    %45 = vector.load %arg6[%c0_21, %c0_22] : memref<2x1xf32, #tpu.memory_space<vmem>>, vector<2x1xf32>
    tpu.vector_store %arg6[%c0_21, %c0_22], %44 {strides = array<i32>} : memref<2x1xf32, #tpu.memory_space<vmem>>, vector<2x1xf32>,
    return
  }
}

</mosaic_0001>

<bundles_post_ra>
// kernel: tpu_custom_call.1
= control target key start
LH: loop header
LB: loop body
LE: loop exit
PB: predicated region body
PF: predicated region fallthrough
CT: control target
= control target key end

     0   :  { %s559_s0 = inlined_call_operand.hbm [shape: f32[16,10], index: 0, kind: input, shape index: {}]   ;;  %s560_s1 = inlined_call_operand.hbm [shape: f32[10,20], index: 1, kind: input, shape index: {}]   ;;  %s561_s2 = inlined_call_operand.vmem [shape: f32[20,20], index: 2, kind: input, shape index: {}]   ;;  %s562_s3 = inlined_call_operand.vmem [shape: f32[1,20], index: 3, kind: input, shape index: {}]   ;;  %s563_s4 = inlined_call_operand.vmem [shape: f32[20,1], index: 4, kind: input, shape index: {}]   ;;  %s564_s5 = inlined_call_operand.<no memory space> [shape: f32[1,1], index: 5, kind: input, shape index: {}]   ;;  %s565_s6 = inlined_call_operand.vmem [shape: f32[2,1], index: 6, kind: output, shape index: {}]  }
   0x1   :  { %v11_v0 = vstv %s564_s5 }
   0x2   :  { %12 = vst [vmem:[#allocation2] sm:$0x1] %v11_v0 }
   0x3   :  { %13 = vsyncpa [#allocation4], 0  ;;  %s19_s25 = sshll.u32 %s559_s0, 4  ;;  %s20_s25 = int_to_ptr.hbm [resolvable:$true] %s19_s25 }
   0x4   :  { %14 = vsyncpa [#allocation6], 0  ;;  %s467_s26 = smov [#allocation3]   ;;  %s32_s30 = sshll.u32 %s560_s1, 4  ;;  %s33_s30 = int_to_ptr.hbm [resolvable:$true] %s32_s30 }
   0x5   :  { %s21_s27 = sshll.u32 %s467_s26, 4  ;;  %s468_s7 = smov 128   ;;  %s22_s27 = int_to_ptr.vmem [resolvable:$true] %s21_s27 }
   0x6   :  { %s469_s8 = smov 8   ;;  %s470_s5 = smov [#allocation5]  }
   0x7   :  { %27 = dma.hbm_to_vmem [thread:$0]  %s20_s25, 256, %s22_s27, [#allocation4], %s468_s7, %s468_s7, %s469_s8  }
   0x8   :  { %s34_s9 = sshll.u32 %s470_s5, 4  ;;  %s35_s9 = int_to_ptr.vmem [resolvable:$true] %s34_s9 }
   0x9   :  { %40 = dma.hbm_to_vmem [thread:$0]  %s33_s30, 256, %s35_s9, [#allocation6], %s468_s7, %s468_s7, %s469_s8  }
   0xa   :  { %463 = dma.done.wait [#allocation4], 256  }
   0xb   :  { %464 = vsyncadd [#allocation4], 4294967040 }
   0xc   :  { %465 = dma.done.wait [#allocation6], 256  }
   0xd   :  { %466 = vsyncadd [#allocation6], 4294967040  ;;  %vm72_vm0 = vcmask 1041408   ;;  %vm106_vm1 = vcmask 1043456   ;;  %v60_v1 = vld [vmem:[#allocation5 + $0x8] sm:$0x3] }
   0xe   :  { %v101_v2 = vld [vmem:[%s561_s2 + $0x10] sm:$0xf]  ;;  %372 = vmatpush.msk.msra.mxu0 %vm72_vm0, %v60_v1  ;;  %v100_v4 = vld [vmem:[%s561_s2 + $0x8] sm:$0xff]  ;;  %vm65_vm2 = vcmask 80896   ;;  %v99_v6 = vld [vmem:[%s561_s2] sm:$0xff]  ;;  %v471_v7 = vmov 0.0  }
   0xf   :  { %v59_v3 = vld [vmem:[#allocation5] sm:$0xff]  ;;  %375 = vmatpush.msk.msra.mxu1 %vm106_vm1, %v101_v2  ;;  %v57_v5 = vld [vmem:[#allocation3] sm:$0xff]  ;;  %376 = vmatpush.msk.msra.mxu2 %vm106_vm1, %v101_v2  ;;  %v397_v8 = vld [vmem:[%s562_s3] ss:$0 sm:$0xff]  ;;  %vm102_vm3 = vcmask 162816   ;;  %vm364_vm4 = vcmask 1024  }
  0x10   :  { %378 = vmatpush.msk.msra.mxu3 %vm106_vm1, %v101_v2  ;;  %91 = vmatpush.msra.mxu0 %v59_v3  ;;  %v58_v24 = vld [vmem:[#allocation3 + $0x8] sm:$0xff]  ;;  %v330_v47 = vld [vmem:[%s563_s4] sm:$0xff] }
  0x11   :  { %124 = vmatpush.msra.mxu1 %v100_v4  ;;  %373 = vmatmul.msk.f32.vlgmr.msra.gmra.mxu0 %vm65_vm2, %v57_v5  ;;  %v332_v45 = vld [vmem:[%s563_s4 + $0x10] sm:$0xf]  ;;  %v331_v46 = vld [vmem:[%s563_s4 + $0x8] sm:$0xff]  ;;  %v398_v53 = vld [vmem:[#allocation2] ss:$0 sm:$0xff] }
  0x12   :  { %149 = vmatpush.msra.mxu2 %v100_v4  ;;  %178 = vmatpush.msra.mxu3 %v100_v4 }
  0x13   :  { %125 = vmatpush.msra.mxu1 %v99_v6  ;;  %386 = vmatpush.msk.msrb.mxu0 %vm106_vm1, %v101_v2 }
  0x14   :  { %126 = vmatmul.f32.vlgmr.msra.gmra.mxu1 %v471_v7  ;;  %150 = vmatpush.msra.mxu2 %v99_v6 }
  0x15   :  { %179 = vmatpush.msra.mxu3 %v99_v6  ;;  %380 = vmatpush.msk.msrb.mxu1 %vm106_vm1, %v101_v2 }
  0x16   :  { %382 = vmatpush.msk.msrb.mxu2 %vm106_vm1, %v101_v2  ;;  %290 = vmatpush.msrb.mxu0 %v100_v4 }
  0x17   :  { %384 = vmatpush.msk.msrb.mxu3 %vm106_vm1, %v101_v2  ;;  %207 = vmatpush.msrb.mxu1 %v100_v4 }
  0x18   :  { %236 = vmatpush.msrb.mxu2 %v100_v4  ;;  %291 = vmatpush.msrb.mxu0 %v99_v6 }
  0x19   :  { %261 = vmatpush.msrb.mxu3 %v100_v4  ;;  %208 = vmatpush.msrb.mxu1 %v99_v6 }
  0x1a   :  { %237 = vmatpush.msrb.mxu2 %v99_v6  ;;  %374 = vmatmul.msk.f32.gmra.mxu0 %vm65_vm2, %v58_v24 }
  0x1b   :  { %262 = vmatpush.msrb.mxu3 %v99_v6  ;;  %388 = vmatpush.msk.msra.mxu1 %vm106_vm1, %v101_v2 }
  0x1d   :  { %319 = vmatpush.msra.mxu1 %v100_v4 }
  0x1f   :  { %320 = vmatpush.msra.mxu1 %v99_v6 }
  0x8e   :  { %v93_v9 = vpop.f32.mrf.mxu0 }
  0x8f   :  { %v94_v10 = vadd.f32 %v397_v8, %v93_v9 }
  0x91   :  { %v127_v11 = vpop.f32.mrf.mxu1 }
  0x92   :  { %v130_v12 = vadd.f32 %v127_v11, %v94_v10 }
  0x94   :  { %399 = vtanh.f32 %v130_v12 }
  0x97   :  { %v96_v30 = vpop.f32.mrf.mxu0 }
  0x98   :  { %v97_v31 = vadd.f32 %v397_v8, %v96_v30 }
  0x9a   :  { %v400_v13 = vpop.eup %399 }
  0x9b   :  { %377 = vmatmul.msk.f32.vlgmr.msra.gmra.mxu2 %vm102_vm3, %v400_v13 }
  0x9c   :  { %390 = vmatpush.msk.msra.mxu2 %vm106_vm1, %v332_v45 }
  0x9e   :  { %358 = vmatpush.msra.mxu2 %v331_v46 }
  0xa0   :  { %359 = vmatpush.msra.mxu2 %v330_v47 }
 0x11e   :  { %v152_v14 = vpop.f32.mrf.mxu2 }
 0x11f   :  { %v156_v15 = vrot.slane %v152_v14, 6 }
 0x121   :  { %v158_v16 = vadd.f32 %v156_v15, %v94_v10 }
 0x123   :  { %401 = vtanh.f32 %v158_v16 }
 0x129   :  { %v402_v17 = vpop.eup %401 }
 0x12a   :  { %v161_v18 = vrot.slane %v402_v17, 2 }
 0x12c   :  { %379 = vmatmul.msk.f32.vlgmr.msra.gmra.mxu3 %vm102_vm3, %v161_v18 }
 0x1af   :  { %v181_v19 = vpop.f32.mrf.mxu3 }
 0x1b0   :  { %v185_v20 = vrot.slane %v181_v19, 4 }
 0x1b2   :  { %v187_v21 = vadd.f32 %v185_v20, %v94_v10 }
 0x1b4   :  { %403 = vtanh.f32 %v187_v21 }
 0x1ba   :  { %v404_v22 = vpop.eup %403 }
 0x1bb   :  { %v190_v23 = vrot.slane %v404_v22, 4 }
 0x1bd   :  { %381 = vmatmul.msk.f32.vlgmr.msrb.gmra.mxu1 %vm102_vm3, %v190_v23 }
 0x23a   :  { %v210_v25 = vpop.f32.mrf.mxu1 }
 0x23b   :  { %v214_v26 = vrot.slane %v210_v25, 2 }
 0x23d   :  { %v216_v27 = vadd.f32 %v214_v26, %v94_v10 }
 0x23f   :  { %405 = vtanh.f32 %v216_v27 }
 0x245   :  { %v406_v28 = vpop.eup %405 }
 0x246   :  { %v219_v29 = vrot.slane %v406_v28, 6 }
 0x248   :  { %383 = vmatmul.msk.f32.vlgmr.msrb.gmra.mxu2 %vm102_vm3, %v219_v29 }
 0x2cb   :  { %v239_v32 = vpop.f32.mrf.mxu2 }
 0x2cc   :  { %v242_v33 = vadd.f32 %v239_v32, %v97_v31 }
 0x2ce   :  { %407 = vtanh.f32 %v242_v33 }
 0x2d4   :  { %v408_v34 = vpop.eup %407 }
 0x2d5   :  { %385 = vmatmul.msk.f32.vlgmr.msrb.gmra.mxu3 %vm102_vm3, %v408_v34 }
 0x358   :  { %v264_v35 = vpop.f32.mrf.mxu3 }
 0x359   :  { %v268_v36 = vrot.slane %v264_v35, 6 }
 0x35b   :  { %v270_v37 = vadd.f32 %v268_v36, %v97_v31 }
 0x35d   :  { %409 = vtanh.f32 %v270_v37 }
 0x363   :  { %v410_v38 = vpop.eup %409 }
 0x364   :  { %v273_v39 = vrot.slane %v410_v38, 2 }
 0x366   :  { %387 = vmatmul.msk.f32.vlgmr.msrb.gmra.mxu0 %vm102_vm3, %v273_v39 }
 0x3e3   :  { %v293_v40 = vpop.f32.mrf.mxu0 }
 0x3e4   :  { %v297_v41 = vrot.slane %v293_v40, 4 }
 0x3e6   :  { %v299_v42 = vadd.f32 %v297_v41, %v97_v31 }
 0x3e8   :  { %411 = vtanh.f32 %v299_v42 }
 0x3ee   :  { %v412_v43 = vpop.eup %411 }
 0x3ef   :  { %v302_v44 = vrot.slane %v412_v43, 4 }
 0x3f1   :  { %389 = vmatmul.msk.f32.vlgmr.msra.gmra.mxu1 %vm102_vm3, %v302_v44 }
 0x46e   :  { %v322_v48 = vpop.f32.mrf.mxu1 }
 0x46f   :  { %v326_v49 = vrot.slane %v322_v48, 2 }
 0x471   :  { %v328_v50 = vadd.f32 %v326_v49, %v97_v31 }
 0x473   :  { %413 = vtanh.f32 %v328_v50 }
 0x479   :  { %v414_v51 = vpop.eup %413 }
 0x47a   :  { %v338_v52 = vrot.slane %v414_v51, 6 }
 0x47c   :  { %391 = vmatmul.msk.f32.vlgmr.msra.gmra.mxu2 %vm102_vm3, %v338_v52 }
 0x4ff   :  { %v361_v54 = vpop.f32.mrf.mxu2 }
 0x500   :  { %v362_v55 = vadd.f32 %v398_v53, %v361_v54 }
 0x502   :  { %365 = vst.msk [vmem:[%s565_s6] sm:$0x3] %vm364_vm4, %v362_v55 }
 0x503   :  { %370 = vsyncpa [#allocation4], 1 }
 0x504   :  { %371 = vsyncpa [#allocation6], 1 }

</bundles_post_ra>
